<compile_context>
chip_gen: v5e
topology: v5e:2x2
jax: 0.10.0
libtpu: 0.0.40
codegen_flags: <defaults>
</compile_context>

<pallas_src>
import math

import jax
import jax.numpy as jnp
from jax.experimental import pallas as pl
from jax.experimental.pallas import tpu as pltpu

_MIN_GRID_STEPS = 8  # pipeline steady state + balanced megacore sharding


# ----------------------------------------------------------------------------
# Kernels (pure elementwise adds).
# ----------------------------------------------------------------------------
def _add2d_kernel(x_ref, pos_ref, o_ref):
    # x_ref / pos_ref / o_ref: (ts, tl) lane-dense tiles.
    o_ref[...] = x_ref[...] + pos_ref[...]


def _add3d_kernel(x_ref, pos_ref, o_ref):
    # x_ref / o_ref: (ts, bt, te); pos_ref: (ts, te) broadcast over the batch.
    o_ref[...] = x_ref[...] + pos_ref[...][:, None, :]


# ----------------------------------------------------------------------------
# Parameter construction (deterministic, mirrors the PyTorch __init__).
# ----------------------------------------------------------------------------
def make_pos_embedding(emb_size: int, maxlen: int = 750,
                       scale_factor: float = 1.0) -> jnp.ndarray:
    den = jnp.exp(-jnp.arange(0, emb_size, 2, dtype=jnp.float32)
                  * math.log(10000.0) / emb_size * scale_factor)        # (E/2,)
    pos = jnp.arange(0, maxlen, dtype=jnp.float32).reshape(maxlen, 1)   # (L, 1)
    angles = pos * den                                                  # (L, E/2)
    pe = jnp.zeros((maxlen, emb_size), dtype=jnp.float32)
    pe = pe.at[:, 0::2].set(jnp.sin(angles))
    pe = pe.at[:, 1::2].set(jnp.cos(angles))
    return pe  # (maxlen, emb_size); the unsqueeze(-2) batch dim is a broadcast


# ----------------------------------------------------------------------------
# Tiling helpers.
# ----------------------------------------------------------------------------
def _ceil_to(x: int, m: int) -> int:
    return -(-x // m) * m


def _sublane_tile(dtype) -> int:
    # Packed sublane tile: 8 for 4-byte, 16 for 2-byte, 32 for 1-byte dtypes.
    return max(8, 32 // jnp.dtype(dtype).itemsize)


def _vmem_capacity_bytes() -> int:
    try:
        return int(pltpu.get_tpu_info().vmem_capacity_bytes)
    except Exception:
        return 64 << 20  # conservative (v7x per-TC VMEM)


def _pick_row_tile(S: int, sub: int, budget_rows: int, other_steps: int) -> int:
    """Sublane-aligned tile over the sequence axis; biases the split towards
    >= _MIN_GRID_STEPS near-equal grid steps when the shape allows."""
    budget_rows = max(budget_rows, sub)
    ts = S if budget_rows >= S else max(sub, (budget_rows // sub) * sub)
    want_row_steps = -(-_MIN_GRID_STEPS // max(other_steps, 1))
    if pl.cdiv(S, ts) < want_row_steps and S > sub:
        n = min(want_row_steps, pl.cdiv(S, sub))
        ts = min(S, _ceil_to(-(-S // n), sub))   # near-equal, sublane-aligned
    return ts


def _choose_tiles_2d(S: int, BE: int, itemsize: int, sub: int,
                     target_bytes: int) -> tuple[int, int]:
    """Tiles for the lane-dense (S, B*E) layout."""
    lane_full = _ceil_to(BE, 128)
    if lane_full * sub * itemsize <= target_bytes:
        tl = BE                                            # full lane extent
    else:
        tl = (target_bytes // (sub * itemsize)) // 128 * 128
        tl = max(128, min(tl, BE))
        if tl >= BE:
            tl = BE
    budget_rows = target_bytes // (_ceil_to(tl, 128) * itemsize)
    ts = _pick_row_tile(S, sub, budget_rows, pl.cdiv(BE, tl))
    return ts, tl


def _choose_tiles_3d(S: int, B: int, E: int, itemsize: int, sub: int,
                     target_bytes: int) -> tuple[int, int, int]:
    """Tiles for the (S, B, E) layout (requires E % 128 == 0, B >= sub)."""
    min_rows = min(sub, S)
    # 1) keep the full embedding axis (contiguous HBM slabs) unless even a
    #    minimal block with it would not fit the budget
    te = E
    if min_rows * sub * _ceil_to(te, 128) * itemsize > target_bytes:
        te = (target_bytes // (min_rows * sub * itemsize)) // 128 * 128
        te = max(128, min(te, E))
    lane_te = _ceil_to(te, 128)
    # 2) full batch if a minimal (min_rows, B, te) block fits, else a
    #    sublane-packed multiple of `sub`
    if min_rows * B * lane_te * itemsize <= target_bytes:
        bt = B
    else:
        bt = (target_bytes // (min_rows * lane_te * itemsize)) // sub * sub
        bt = max(sub, min(bt, B))
    # 3) sequence tile from the remaining budget, then force enough total steps
    budget_rows = target_bytes // max(bt * lane_te * itemsize, 1)
    other_steps = pl.cdiv(B, bt) * pl.cdiv(E, te)
    ts = _pick_row_tile(S, sub, budget_rows, other_steps)
    return ts, bt, te


# ----------------------------------------------------------------------------
# Wrapper.
# ----------------------------------------------------------------------------
def positional_encoding(token_embedding: jnp.ndarray,
                        pos_embedding: jnp.ndarray,
                        *,
                        target_block_bytes: int = 2 << 20,
                        donate_input: bool = False) -> jnp.ndarray:
    """token_embedding: (S, B, E); pos_embedding: (maxlen, E). Returns (S, B, E).

    Set donate_input=True only when the caller can legally donate
    token_embedding (avoids allocating a second full-size HBM buffer).
    """
    S, B, E = token_embedding.shape
    dtype = token_embedding.dtype
    itemsize = jnp.dtype(dtype).itemsize
    sub = _sublane_tile(dtype)

    # Static slice + cast to the activation dtype.  NOTE: PyTorch adds the f32
    # buffer (promoting bf16 activations); adding in the activation dtype is a
    # deliberate numerics deviation that halves pos DMA for bf16 models.
    pos = pos_embedding[:S].astype(dtype)                    # (S, E)

    vmem_cap = min(40 << 20, (_vmem_capacity_bytes() * 5) // 8)
    alias = {0: 0} if donate_input else {}

    use_2d = (B < sub) or (E % 128 != 0)
    if use_2d:
        # Lane/sublane-dense layout: fold (B, E) onto the lane axis so stores
        # are unmasked and small B costs no sublane padding.  pos is tiled
        # along lanes once, wrapper-side (outside the hot loop).
        BE = B * E
        x2 = token_embedding.reshape(S, BE)
        pos2 = jnp.tile(pos, (1, B)) if B > 1 else pos        # (S, BE)
        ts, tl = _choose_tiles_2d(S, BE, itemsize, sub, target_block_bytes)
        grid = (pl.cdiv(S, ts), pl.cdiv(BE, tl))
        blk = _ceil_to(ts, sub) * _ceil_to(tl, 128) * itemsize
        vmem_limit = int(min(max(2 * 3 * blk + (4 << 20), 16 << 20), vmem_cap))

        out2 = pl.pallas_call(
            _add2d_kernel,
            out_shape=jax.ShapeDtypeStruct((S, BE), dtype),
            grid_spec=pltpu.PrefetchScalarGridSpec(
                num_scalar_prefetch=0,
                grid=grid,
                in_specs=[pl.BlockSpec((ts, tl), lambda i, j: (i, j)),
                          pl.BlockSpec((ts, tl), lambda i, j: (i, j))],
                out_specs=pl.BlockSpec((ts, tl), lambda i, j: (i, j))),
            compiler_params=pltpu.CompilerParams(
                dimension_semantics=("parallel", "parallel"),
                vmem_limit_bytes=vmem_limit),
            input_output_aliases=alias,
        )(x2, pos2)
        out = out2.reshape(S, B, E)
    else:
        # Batch-tiled 3D path: te = E (contiguous slabs), bt a packed multiple
        # of the sublane tile, ts split for >= 8 near-equal grid steps.
        ts, bt, te = _choose_tiles_3d(S, B, E, itemsize, sub,
                                      target_block_bytes)
        grid = (pl.cdiv(S, ts), pl.cdiv(B, bt), pl.cdiv(E, te))
        x_blk = ts * _ceil_to(bt, sub) * _ceil_to(te, 128) * itemsize
        p_blk = _ceil_to(ts, sub) * _ceil_to(te, 128) * itemsize
        vmem_limit = int(min(max(2 * (2 * x_blk + p_blk) + (4 << 20), 16 << 20),
                             vmem_cap))

        out = pl.pallas_call(
            _add3d_kernel,
            out_shape=jax.ShapeDtypeStruct((S, B, E), dtype),
            grid_spec=pltpu.PrefetchScalarGridSpec(
                num_scalar_prefetch=0,
                grid=grid,
                in_specs=[pl.BlockSpec((ts, bt, te),
                                       lambda i, j, k: (i, j, k)),
                          pl.BlockSpec((ts, te), lambda i, j, k: (i, k))],
                out_specs=pl.BlockSpec((ts, bt, te),
                                       lambda i, j, k: (i, j, k))),
            compiler_params=pltpu.CompilerParams(
                dimension_semantics=("parallel", "parallel", "parallel"),
                vmem_limit_bytes=vmem_limit),
            input_output_aliases=alias,
        )(token_embedding, pos)

    # TODO(synk): nn.Dropout is identity at inference; training-mode dropout
    # (pltpu.prng_seed + pltpu.stateful_bernoulli) is not applied here.
    return out


# ----------------------------------------------------------------------------
# Demo / self-test.
# ----------------------------------------------------------------------------
if __name__ == "__main__":
    # Case 1: module-like small shapes (seq-first, like the PyTorch module).
    # Small B / non-128 E -> lane-dense 2D path.
    S, B, E = 8, 2, 32
    x = jax.random.normal(jax.random.PRNGKey(0), (S, B, E), dtype=jnp.float32)
    pe = make_pos_embedding(E, maxlen=750, scale_factor=1.0)

    out = jax.block_until_ready(positional_encoding(x, pe))
    ref = x + pe[:S][:, None, :]
    assert out.shape == (S, B, E)
    assert jnp.allclose(out, ref, atol=1e-6, rtol=1e-6), "2D-path mismatch"

    # Case 2: batch-tiled 3D path (lane-aligned E, sublane-full B).
    S2, B2, E2 = 16, 8, 128
    x2 = jax.random.normal(jax.random.PRNGKey(1), (S2, B2, E2),
                           dtype=jnp.float32)
    pe2 = make_pos_embedding(E2, maxlen=750)
    out2 = jax.block_until_ready(positional_encoding(x2, pe2))
    ref2 = x2 + pe2[:S2][:, None, :]
    assert jnp.allclose(out2, ref2, atol=1e-6, rtol=1e-6), "3D-path mismatch"

    # Case 3: ragged multi-step grid (tiny block budget) + bf16 activations.
    S3, B3, E3 = 20, 2, 32
    x3 = jax.random.normal(jax.random.PRNGKey(2), (S3, B3, E3),
                           dtype=jnp.float32).astype(jnp.bfloat16)
    out3 = jax.block_until_ready(
        positional_encoding(x3, pe, target_block_bytes=4096))
    ref3 = x3 + pe[:S3].astype(jnp.bfloat16)[:, None, :]
    assert out3.dtype == jnp.bfloat16
    assert jnp.allclose(out3.astype(jnp.float32), ref3.astype(jnp.float32),
                        atol=1e-2), "bf16 ragged-edge mismatch"

    print("KERNEL_OK")
</pallas_src>

<mosaic_0001>
module attributes {stable_mosaic.version = 11 : i64} {
  func.func @_add2d_kernel(%arg0: i32, %arg1: i32, %arg2: memref<8x64xf32, #tpu.memory_space<vmem>>, %arg3: memref<8x64xf32, #tpu.memory_space<vmem>>, %arg4: memref<8x64xf32, #tpu.memory_space<vmem>>) attributes {dimension_semantics = [#tpu.dimension_semantics<parallel>, #tpu.dimension_semantics<parallel>], iteration_bounds = array<i64: 1, 1>, scalar_prefetch = 0 : i64, scratch_operands = 0 : i64, tpu.core_type = #tpu.core_type<tc>, window_params = [{transform_indices = @transform_0, window_bounds = array<i64: 8, 64>}, {transform_indices = @transform_1, window_bounds = array<i64: 8, 64>}, {transform_indices = @transform_2, window_bounds = array<i64: 8, 64>}]} {
    %c0 = arith.constant 0 : index
    %c0_0 = arith.constant 0 : index
    %0 = vector.load %arg2[%c0, %c0_0] : memref<8x64xf32, #tpu.memory_space<vmem>>, vector<8x64xf32>
    %c0_1 = arith.constant 0 : index
    %c0_2 = arith.constant 0 : index
    %1 = vector.load %arg3[%c0_1, %c0_2] : memref<8x64xf32, #tpu.memory_space<vmem>>, vector<8x64xf32>
    %2 = arith.addf %0, %1 : vector<8x64xf32>
    %c0_3 = arith.constant 0 : index
    %c0_4 = arith.constant 0 : index
    %3 = vector.load %arg4[%c0_3, %c0_4] : memref<8x64xf32, #tpu.memory_space<vmem>>, vector<8x64xf32>
    tpu.vector_store %arg4[%c0_3, %c0_4], %2 {strides = array<i32>} : memref<8x64xf32, #tpu.memory_space<vmem>>, vector<8x64xf32>,
    return
  }
  func.func @transform_0(%arg0: i32, %arg1: i32) -> (i32, i32) {
    %c0_i32 = arith.constant 0 : i32
    return %arg0, %arg1 : i32, i32
  }
  func.func @transform_1(%arg0: i32, %arg1: i32) -> (i32, i32) {
    %c0_i32 = arith.constant 0 : i32
    return %arg0, %arg1 : i32, i32
  }
  func.func @transform_2(%arg0: i32, %arg1: i32) -> (i32, i32) {
    %c0_i32 = arith.constant 0 : i32
    return %arg0, %arg1 : i32, i32
  }
}

</mosaic_0001>

<bundles_post_ra>
// kernel: tpu_custom_call.1
= control target key start
LH: loop header
LB: loop body
LE: loop exit
PB: predicated region body
PF: predicated region fallthrough
CT: control target
= control target key end

     0   :  { %7 = vsyncpa [#allocation3], 0  ;;  %s171_s0 = inlined_call_operand.hbm [shape: f32[8,64], index: 0, kind: input, shape index: {}]   ;;  %s172_s1 = inlined_call_operand.hbm [shape: f32[8,64], index: 1, kind: input, shape index: {}]   ;;  %s173_s2 = inlined_call_operand.hbm [shape: f32[8,64], index: 2, kind: output, shape index: {}]  }
   0x1   :  { %8 = vsyncpa [#allocation6], 0 }
   0x2   :  { %9 = vsyncpa [#allocation4], 0  ;;  %s15_s11 = sshll.u32 %s171_s0, 4  ;;  %s144_s12 = smov [#allocation2]   ;;  %s16_s11 = int_to_ptr.hbm [resolvable:$true] %s15_s11 }
   0x3   :  { %s17_s13 = sshll.u32 %s144_s12, 4  ;;  %s26_s16 = sshll.u32 %s172_s1, 4  ;;  %s18_s13 = int_to_ptr.vmem [resolvable:$true] %s17_s13  ;;  %s27_s16 = int_to_ptr.hbm [resolvable:$true] %s26_s16 }
   0x4   :  { %20 = dma.hbm_to_vmem [thread:$0]  %s16_s11, 128, %s18_s13, [#allocation3]  }
   0x5   :  { %s145_s17 = smov [#allocation5]  }
   0x6   :  { %s28_s18 = sshll.u32 %s145_s17, 4  ;;  %s29_s18 = int_to_ptr.vmem [resolvable:$true] %s28_s18 }
   0x7   :  { %31 = dma.hbm_to_vmem [thread:$0]  %s27_s16, 128, %s29_s18, [#allocation6]  }
   0x8   :  { %138 = dma.done.wait [#allocation3], 128  }
   0x9   :  { %139 = vsyncadd [#allocation3], 4294967168 }
   0xa   :  { %140 = dma.done.wait [#allocation6], 128  }
   0xb   :  { %141 = vsyncadd [#allocation6], 4294967168  ;;  %s146_s19 = smov [#allocation7]   ;;  %s52_s22 = sshll.u32 %s173_s2, 4  ;;  %v40_v0 = vld [vmem:[#allocation2] sm:$0xff]  ;;  %v41_v1 = vld [vmem:[#allocation5] sm:$0xff]  ;;  %s53_s22 = int_to_ptr.hbm [resolvable:$true] %s52_s22 }
   0xc   :  { %s50_s0 = sshll.u32 %s146_s19, 4  ;;  %vm43_vm0 = vcmask 523264   ;;  %v42_v2 = vadd.f32 %v41_v1, %v40_v0  ;;  %s51_s0 = int_to_ptr.vmem [resolvable:$true] %s50_s0 }
   0xe   :  { %44 = vst.msk [vmem:[#allocation7] sm:$0xff] %vm43_vm0, %v42_v2 }
   0xf   :  { %55 = dma.vmem_to_hbm [thread:$0]  %s51_s0, 128, %s53_s22, [#allocation4]  }
  0x10   :  { %142 = dma.done.wait [#allocation4], 128  }
  0x11   :  { %143 = vsyncadd [#allocation4], 4294967168 }
  0x12   :  { %60 = vsyncpa [#allocation3], 1 }
  0x13   :  { %61 = vsyncpa [#allocation6], 1 }
  0x14   :  { %62 = vsyncpa [#allocation4], 1 }

</bundles_post_ra>
